<compile_context>
chip_gen: v6e
topology: v6e:2x2x1
jax: 0.10.0
libtpu: 0.0.40
codegen_flags: <defaults>
</compile_context>

<pallas_src>
import functools

import numpy as np
import jax
import jax.numpy as jnp
from jax.experimental import pallas as pl
from jax.experimental.pallas import tpu as pltpu


def _make_timescales(embed_dim: int, max_wavelength: float = 10000.0) -> np.ndarray:
    assert embed_dim % 2 == 0
    return np.power(max_wavelength, -np.arange(0, embed_dim, 2) / embed_dim).astype(np.float32)


def _make_sinusoid_table(embed_dim: int, n_steps: int, max_wavelength: float = 10000.0) -> np.ndarray:
    """Exact reproduction of Timestep.__init__ buffer (used only by the reference check)."""
    timescales = np.power(max_wavelength, -np.arange(0, embed_dim, 2) / embed_dim)
    timesteps = np.arange(n_steps + 1)
    angles = timesteps[:, np.newaxis] * timescales[np.newaxis, :]
    return np.concatenate([np.sin(angles), np.cos(angles)], axis=-1).astype(np.float32)


def pack_params(timescales, w1_t, b1, w2_t, b2):
    """Pack everything the kernel needs into one (8 + 2H, max(H, O)) f32 buffer.

      row 0,           lanes [0:H) : [timescales, timescales] (duplicated for sin|cos halves)
      row 1,           lanes [0:H) : b1
      row 2,           lanes [0:O) : b2
      rows [8, 8+H),   lanes [0:H) : w1^T  (hidden weight, [in, out])
      rows [8+H,8+2H), lanes [0:O) : w2^T  (out weight,   [in, out])
    """
    H = w1_t.shape[0]
    O = w2_t.shape[1]
    width = max(H, O)
    buf = jnp.zeros((8 + 2 * H, width), jnp.float32)
    buf = buf.at[0, :H].set(jnp.concatenate([timescales, timescales]))
    buf = buf.at[1, :H].set(b1)
    buf = buf.at[2, :O].set(b2)
    buf = buf.at[8:8 + H, :H].set(w1_t)
    buf = buf.at[8 + H:8 + 2 * H, :O].set(w2_t)
    return buf


def _time_embed_kernel(t_ref, p_ref, out_ref, *, hidden_dim: int, out_dim: int):
    """t_ref: SMEM (B,) int32; p_ref: VMEM packed f32 params; out_ref: VMEM (B, out_dim) f32."""
    B = out_ref.shape[0]
    H = hidden_dim
    half = H // 2
    O = out_dim

    # Static slices into the single packed parameter buffer (no extra DMAs).
    ts2 = p_ref[0:1, 0:H]                  # (1, H)  duplicated timescales
    b1 = p_ref[1:2, 0:H]                   # (1, H)
    b2 = p_ref[2:3, 0:O]                   # (1, O)
    w1 = p_ref[8:8 + H, 0:H]               # (H, H)
    w2 = p_ref[8 + H:8 + 2 * H, 0:O]       # (H, O)

    # Build a (B, 1) f32 column of timestep values from SMEM scalars (B is tiny & static).
    row_ids = jax.lax.broadcasted_iota(jnp.int32, (B, 1), 0)
    t_col = jnp.zeros((B, 1), jnp.float32)
    for i in range(B):  # unrolled selects on one (B, 1) sub-vreg
        t_col = jnp.where(row_ids == i, t_ref[i].astype(jnp.float32), t_col)

    # Sinusoidal embedding computed in-kernel: e = [sin(t*ts), cos(t*ts)].
    # (Matches the reference table exactly for t in [0, n_steps]; no bounds behaviour needed.)
    angles = t_col * ts2                                       # (B, H)
    lane = jax.lax.broadcasted_iota(jnp.int32, (B, H), 1)
    e = jnp.where(lane < half, jnp.sin(angles), jnp.cos(angles))

    # hidden Linear + swish
    x = jnp.dot(e, w1, preferred_element_type=jnp.float32) + b1
    x = x * jax.nn.sigmoid(x)
    # out Linear
    y = jnp.dot(x, w2, preferred_element_type=jnp.float32) + b2
    out_ref[...] = y.astype(out_ref.dtype)


def time_embed_forward(t, packed_params, *, hidden_dim: int, out_dim: int):
    """t: (B,) int32 timesteps -> (B, out_dim) float32. Single grid-less call; everything VMEM-resident."""
    B = t.shape[0]
    H, O = hidden_dim, out_dim
    cost = pl.CostEstimate(
        flops=2 * B * H * (H + O) + 8 * B * H,
        transcendentals=3 * B * H,                                  # sin + cos + sigmoid
        bytes_accessed=int(packed_params.size) * 4 + B * 4 + B * O * 4,
    )
    kernel = functools.partial(_time_embed_kernel, hidden_dim=H, out_dim=O)
    return pl.pallas_call(
        kernel,
        out_shape=jax.ShapeDtypeStruct((B, O), jnp.float32),
        in_specs=[
            pl.BlockSpec(memory_space=pltpu.MemorySpace.SMEM),   # t: scalar reads, no VMEM DMA
            pl.BlockSpec(memory_space=pltpu.MemorySpace.VMEM),   # packed params: one DMA
        ],
        out_specs=pl.BlockSpec(memory_space=pltpu.MemorySpace.VMEM),
        cost_estimate=cost,
    )(t.astype(jnp.int32), packed_params)


if __name__ == "__main__":
    hidden_dim = 32
    out_dim = 64
    n_steps = 100
    batch = 8

    key = jax.random.PRNGKey(0)
    k1, k2, k3, k4, k5 = jax.random.split(key, 5)

    # torch.nn.Linear keeps W as (out, in); the kernel stores the transpose (in, out).
    w1_t = jax.random.normal(k1, (hidden_dim, hidden_dim), jnp.float32) * 0.05
    b1 = jax.random.normal(k2, (hidden_dim,), jnp.float32) * 0.05
    w2_t = jax.random.normal(k3, (hidden_dim, out_dim), jnp.float32) * 0.05
    b2 = jax.random.normal(k4, (out_dim,), jnp.float32) * 0.05

    timescales = jnp.asarray(_make_timescales(hidden_dim))
    packed = pack_params(timescales, w1_t, b1, w2_t, b2)   # packed once, reused every call

    t = jax.random.randint(k5, (batch,), 0, n_steps + 1, dtype=jnp.int32)

    out = time_embed_forward(t, packed, hidden_dim=hidden_dim, out_dim=out_dim)
    out = jax.block_until_ready(out)

    # Reference follows the PyTorch module exactly (precomputed numpy table gather).
    table = jnp.asarray(_make_sinusoid_table(hidden_dim, n_steps))
    e_ref = table[t]
    x_ref = e_ref @ w1_t + b1
    x_ref = x_ref * jax.nn.sigmoid(x_ref)
    ref = x_ref @ w2_t + b2

    np.testing.assert_allclose(np.asarray(out), np.asarray(ref), rtol=5e-4, atol=5e-4)
    print("KERNEL_OK")
</pallas_src>

<mosaic_0001>
module attributes {stable_mosaic.version = 11 : i64} {
  func.func @_time_embed_kernel(%arg0: memref<8xi32, #tpu.memory_space<smem>>, %arg1: memref<72x64xf32, #tpu.memory_space<vmem>>, %arg2: memref<8x64xf32, #tpu.memory_space<vmem>>) attributes {dimension_semantics = [], scalar_prefetch = 0 : i64, scratch_operands = 0 : i64, tpu.core_type = #tpu.core_type<tc>} {
    %c0 = arith.constant 0 : index
    %c0_0 = arith.constant 0 : index
    %0 = vector.load %arg1[%c0, %c0_0] : memref<72x64xf32, #tpu.memory_space<vmem>>, vector<1x32xf32>
    %c1 = arith.constant 1 : index
    %c0_1 = arith.constant 0 : index
    %1 = vector.load %arg1[%c1, %c0_1] : memref<72x64xf32, #tpu.memory_space<vmem>>, vector<1x32xf32>
    %c2 = arith.constant 2 : index
    %c0_2 = arith.constant 0 : index
    %2 = vector.load %arg1[%c2, %c0_2] : memref<72x64xf32, #tpu.memory_space<vmem>>, vector<1x64xf32>
    %c8 = arith.constant 8 : index
    %c0_3 = arith.constant 0 : index
    %3 = vector.load %arg1[%c8, %c0_3] : memref<72x64xf32, #tpu.memory_space<vmem>>, vector<32x32xf32>
    %c40 = arith.constant 40 : index
    %c0_4 = arith.constant 0 : index
    %4 = vector.load %arg1[%c40, %c0_4] : memref<72x64xf32, #tpu.memory_space<vmem>>, vector<32x64xf32>
    %5 = tpu.iota {dimensions = array<i32: 0>} : vector<8x1xi32>
    %cst = arith.constant 0.000000e+00 : f32
    %6 = vector.broadcast %cst : f32 to vector<8x1xf32>
    %c0_i32 = arith.constant 0 : i32
    %7 = vector.broadcast %c0_i32 : i32 to vector<8x1xi32>
    %8 = arith.cmpi eq, %5, %7 : vector<8x1xi32>
    %c0_5 = arith.constant 0 : index
    %9 = memref.load %arg0[%c0_5] : memref<8xi32, #tpu.memory_space<smem>>
    %10 = arith.sitofp %9 : i32 to f32
    %11 = vector.broadcast %10 : f32 to vector<8x1xf32>
    %12 = arith.select %8, %11, %6 : vector<8x1xi1>, vector<8x1xf32>
    %c1_i32 = arith.constant 1 : i32
    %13 = vector.broadcast %c1_i32 : i32 to vector<8x1xi32>
    %14 = arith.cmpi eq, %5, %13 : vector<8x1xi32>
    %c1_6 = arith.constant 1 : index
    %15 = memref.load %arg0[%c1_6] : memref<8xi32, #tpu.memory_space<smem>>
    %16 = arith.sitofp %15 : i32 to f32
    %17 = vector.broadcast %16 : f32 to vector<8x1xf32>
    %18 = arith.select %14, %17, %12 : vector<8x1xi1>, vector<8x1xf32>
    %c2_i32 = arith.constant 2 : i32
    %19 = vector.broadcast %c2_i32 : i32 to vector<8x1xi32>
    %20 = arith.cmpi eq, %5, %19 : vector<8x1xi32>
    %c2_7 = arith.constant 2 : index
    %21 = memref.load %arg0[%c2_7] : memref<8xi32, #tpu.memory_space<smem>>
    %22 = arith.sitofp %21 : i32 to f32
    %23 = vector.broadcast %22 : f32 to vector<8x1xf32>
    %24 = arith.select %20, %23, %18 : vector<8x1xi1>, vector<8x1xf32>
    %c3_i32 = arith.constant 3 : i32
    %25 = vector.broadcast %c3_i32 : i32 to vector<8x1xi32>
    %26 = arith.cmpi eq, %5, %25 : vector<8x1xi32>
    %c3 = arith.constant 3 : index
    %27 = memref.load %arg0[%c3] : memref<8xi32, #tpu.memory_space<smem>>
    %28 = arith.sitofp %27 : i32 to f32
    %29 = vector.broadcast %28 : f32 to vector<8x1xf32>
    %30 = arith.select %26, %29, %24 : vector<8x1xi1>, vector<8x1xf32>
    %c4_i32 = arith.constant 4 : i32
    %31 = vector.broadcast %c4_i32 : i32 to vector<8x1xi32>
    %32 = arith.cmpi eq, %5, %31 : vector<8x1xi32>
    %c4 = arith.constant 4 : index
    %33 = memref.load %arg0[%c4] : memref<8xi32, #tpu.memory_space<smem>>
    %34 = arith.sitofp %33 : i32 to f32
    %35 = vector.broadcast %34 : f32 to vector<8x1xf32>
    %36 = arith.select %32, %35, %30 : vector<8x1xi1>, vector<8x1xf32>
    %c5_i32 = arith.constant 5 : i32
    %37 = vector.broadcast %c5_i32 : i32 to vector<8x1xi32>
    %38 = arith.cmpi eq, %5, %37 : vector<8x1xi32>
    %c5 = arith.constant 5 : index
    %39 = memref.load %arg0[%c5] : memref<8xi32, #tpu.memory_space<smem>>
    %40 = arith.sitofp %39 : i32 to f32
    %41 = vector.broadcast %40 : f32 to vector<8x1xf32>
    %42 = arith.select %38, %41, %36 : vector<8x1xi1>, vector<8x1xf32>
    %c6_i32 = arith.constant 6 : i32
    %43 = vector.broadcast %c6_i32 : i32 to vector<8x1xi32>
    %44 = arith.cmpi eq, %5, %43 : vector<8x1xi32>
    %c6 = arith.constant 6 : index
    %45 = memref.load %arg0[%c6] : memref<8xi32, #tpu.memory_space<smem>>
    %46 = arith.sitofp %45 : i32 to f32
    %47 = vector.broadcast %46 : f32 to vector<8x1xf32>
    %48 = arith.select %44, %47, %42 : vector<8x1xi1>, vector<8x1xf32>
    %c7_i32 = arith.constant 7 : i32
    %49 = vector.broadcast %c7_i32 : i32 to vector<8x1xi32>
    %50 = arith.cmpi eq, %5, %49 : vector<8x1xi32>
    %c7 = arith.constant 7 : index
    %51 = memref.load %arg0[%c7] : memref<8xi32, #tpu.memory_space<smem>>
    %52 = arith.sitofp %51 : i32 to f32
    %53 = vector.broadcast %52 : f32 to vector<8x1xf32>
    %54 = arith.select %50, %53, %48 : vector<8x1xi1>, vector<8x1xf32>
    %55 = vector.broadcast %54 : vector<8x1xf32> to vector<8x32xf32>
    %56 = vector.broadcast %0 : vector<1x32xf32> to vector<8x32xf32>
    %57 = arith.mulf %55, %56 : vector<8x32xf32>
    %58 = tpu.iota {dimensions = array<i32: 1>} : vector<8x32xi32>
    %c16_i32 = arith.constant 16 : i32
    %59 = vector.broadcast %c16_i32 : i32 to vector<8x32xi32>
    %60 = arith.cmpi slt, %58, %59 : vector<8x32xi32>
    %61 = math.sin %57 : vector<8x32xf32>
    %62 = math.cos %57 : vector<8x32xf32>
    %63 = arith.select %60, %61, %62 : vector<8x32xi1>, vector<8x32xf32>
    %cst_8 = arith.constant dense<0.000000e+00> : vector<8x32xf32>
    %64 = tpu.matmul %63, %3, %cst_8 {dimension_numbers = #tpu.dot_dimension_numbers<[1], [0], [0], [1], [0, 0, 1, 1], [], []>} : vector<8x32xf32>, vector<32x32xf32>, vector<8x32xf32> -> vector<8x32xf32>
    %65 = vector.broadcast %1 : vector<1x32xf32> to vector<8x32xf32>
    %66 = arith.addf %64, %65 : vector<8x32xf32>
    %67 = arith.negf %66 : vector<8x32xf32>
    %68 = math.exp %67 : vector<8x32xf32>
    %cst_9 = arith.constant 1.000000e+00 : f32
    %69 = vector.broadcast %cst_9 : f32 to vector<8x32xf32>
    %70 = arith.addf %69, %68 : vector<8x32xf32>
    %71 = arith.divf %69, %70 : vector<8x32xf32>
    %72 = arith.mulf %66, %71 : vector<8x32xf32>
    %cst_10 = arith.constant dense<0.000000e+00> : vector<8x64xf32>
    %73 = tpu.matmul %72, %4, %cst_10 {dimension_numbers = #tpu.dot_dimension_numbers<[1], [0], [0], [1], [0, 0, 1, 1], [], []>} : vector<8x32xf32>, vector<32x64xf32>, vector<8x64xf32> -> vector<8x64xf32>
    %74 = vector.broadcast %2 : vector<1x64xf32> to vector<8x64xf32>
    %75 = arith.addf %73, %74 : vector<8x64xf32>
    %c0_11 = arith.constant 0 : index
    %c0_12 = arith.constant 0 : index
    %76 = vector.load %arg2[%c0_11, %c0_12] : memref<8x64xf32, #tpu.memory_space<vmem>>, vector<8x64xf32>
    tpu.vector_store %arg2[%c0_11, %c0_12], %75 {strides = array<i32>} : memref<8x64xf32, #tpu.memory_space<vmem>>, vector<8x64xf32>,
    return
  }
}

</mosaic_0001>

<bundles_post_ra>
// kernel: tpu_custom_call.1
= control target key start
LH: loop header
LB: loop body
LE: loop exit
PB: predicated region body
PF: predicated region fallthrough
CT: control target
= control target key end

     0   :  { %7 = vsyncpa [#allocation4], 0  ;;  %s689_s0 = inlined_call_operand.vmem [shape: s32[8], index: 0, kind: input, shape index: {}]   ;;  %s690_s1 = inlined_call_operand.vmem [shape: f32[72,64], index: 1, kind: input, shape index: {}]   ;;  %s691_s2 = inlined_call_operand.hbm [shape: f32[8,64], index: 2, kind: output, shape index: {}]  }
   0x1   :  { %8 = vsyncpa [#allocation3], 0  ;;  %s15_s11 = sshll.u32 %s689_s0, 4  ;;  %s16_s11 = int_to_ptr.vmem [resolvable:$true] %s15_s11 }
   0x2   :  { %s548_s12 = scalar_lea.vmem %s16_s11, 16  ;;  %p553_p1 = scmp.lt.s32.totalorder %s16_s11, %s16_s11 }
   0x3   :  { %p549_p0 = scmp.ne.s32.totalorder %s16_s11, %s548_s12  ;;  %p554_p2 = scmp.lt.s32.totalorder %s548_s12, %s548_s12 }
   0x5   :  { %p555_p3 = por %p554_p2, %p553_p1 }
   0x7   :  { %p556_p4 = pnand %p555_p3, %p549_p0 }
   0x9   :  { %559 = shalt.err (!%p556_p4)
}
   0xa   :  { %s584_s13 = smov [#allocation2]  }
   0xb   :  { %18 = dma.vmem_to_smem %s16_s11, 16, %s584_s13, [#allocation4]  }
   0xc   :  { %580 = dma.done.wait [#allocation4], 16  }
   0xd   :  { %581 = vsyncadd [#allocation4], 4294967280 }
   0xe   :  { %24 = sfence }
   0xf   :  { %v31_v0 = vld [vmem:[%s690_s1 + $0x20] sm:$0xff]  ;;  %v36_v1 = vlaneseq  ;;  %v585_v2 = vmov 0.0   ;;  %v30_v3 = vld [vmem:[%s690_s1 + $0x18] sm:$0xff]  ;;  %vm586_vm0 = vmmov 0   ;;  %s39_s17 = sld [smem:[#allocation2]]  ;;  %v29_v4 = vld [vmem:[%s690_s1 + $0x10] sm:$0xff] }
  0x10   :  { %504 = vmatprep.subr.mxu0 %v585_v2  ;;  %512 = vmatprep.mubr.msk.f32.mxu0 %vm586_vm0, %v585_v2  ;;  %s473_s18 = sld [smem:[#allocation2 + $0x1]]  ;;  %v28_v6 = vld [vmem:[%s690_s1 + $0x8] sm:$0xff]  ;;  %v480_v18 = vld [vmem:[%s690_s1] ss:$0 sm:$0xff]  ;;  %v587_v36 = vmov 683565275  }
  0x11   :  { %505 = vmatpush3.msra.mxu0 %v31_v0  ;;  %515 = vmatprep.subr.mxu1 %v585_v2  ;;  %v37_v5 = vshrl.u32 %v36_v1, 7  ;;  %s474_s21 = sld [smem:[#allocation2 + $0x2]]  ;;  %v588_v38 = vmov 2475754826   ;;  %v589_v40 = vmov 2131351028  }
  0x12   :  { %506 = vmatprep.subr.mxu0 %v585_v2  ;;  %523 = vmatprep.mubr.msk.f32.mxu1 %vm586_vm0, %v585_v2  ;;  %s475_s22 = sld [smem:[#allocation2 + $0x3]]  ;;  %v590_v42 = vmov 2102212464   ;;  %v591_v44 = vmov 920167782  }
  0x13   :  { %507 = vmatpush3.msra.mxu0 %v30_v3  ;;  %s476_s25 = sld [smem:[#allocation2 + $0x4]]  ;;  %vm38_vm1 = vcmp.eq.s32.totalorder %v37_v5, 0  ;;  %vm43_vm2 = vcmp.eq.s32.totalorder %v37_v5, 1  ;;  %vm48_vm3 = vcmp.eq.s32.totalorder %v37_v5, 2  ;;  %vm53_vm4 = vcmp.eq.s32.totalorder %v37_v5, 3 }
  0x14   :  { %508 = vmatprep.subr.mxu0 %v585_v2  ;;  %s631_s26 = sld [smem:[#allocation2 + $0x5]]  ;;  %vm58_vm5 = vcmp.eq.s32.totalorder %v37_v5, 4  ;;  %vm63_vm6 = vcmp.eq.s32.totalorder %v37_v5, 5  ;;  %vm68_vm7 = vcmp.eq.s32.totalorder %v37_v5, 6  ;;  %vm73_vm8 = vcmp.eq.s32.totalorder %v37_v5, 7 }
  0x15   :  { %509 = vmatpush3.msra.mxu0 %v29_v4  ;;  %s40_s27 = scvt.s32.f32 %s39_s17  ;;  %s634_s28 = sld [smem:[#allocation2 + $0x6]]  ;;  %v592_v51 = vmov 1326507024  }
  0x16   :  { %510 = vmatprep.subr.mxu0 %v585_v2  ;;  %s45_s29 = scvt.s32.f32 %s473_s18  ;;  %s479_s30 = sld [smem:[#allocation2 + $0x7]] }
  0x17   :  { %511 = vmatpush3.msra.mxu0 %v28_v6  ;;  %v41_v7 = vstv %s40_s27  ;;  %s50_s3 = scvt.s32.f32 %s474_s21 }
  0x18   :  { %v42_v8 = vsel %vm38_vm1, %v41_v7, 0.0  ;;  %v46_v9 = vstv %s45_s29  ;;  %s55_s4 = scvt.s32.f32 %s475_s22  ;;  %s593_s22 = smov [#allocation5]  }
  0x19   :  { %v47_v10 = vsel %vm43_vm2, %v46_v9, %v42_v8  ;;  %v51_v11 = vstv %s50_s3  ;;  %s60_s5 = scvt.s32.f32 %s476_s25  ;;  %s464_s23 = sshll.u32 %s593_s22, 4  ;;  %s465_s23 = int_to_ptr.vmem [resolvable:$true] %s464_s23 }
  0x1a   :  { %v52_v12 = vsel %vm48_vm3, %v51_v11, %v47_v10  ;;  %v56_v13 = vstv %s55_s4  ;;  %s65_s6 = scvt.s32.f32 %s631_s26  ;;  %s560_s24 = scalar_lea.vmem %s465_s23, 128 }
  0x1b   :  { %v57_v14 = vsel %vm53_vm4, %v56_v13, %v52_v12  ;;  %v61_v15 = vstv %s60_s5  ;;  %s70_s7 = scvt.s32.f32 %s634_s28  ;;  %p561_p5 = scmp.ne.s32.totalorder %s465_s23, %s560_s24 }
  0x1c   :  { %v62_v16 = vsel %vm58_vm5, %v61_v15, %v57_v14  ;;  %v66_v17 = vstv %s65_s6  ;;  %s75_s8 = scvt.s32.f32 %s479_s30  ;;  %p565_p6 = scmp.lt.s32.totalorder %s465_s23, %s465_s23 }
  0x1d   :  { %v67_v19 = vsel %vm63_vm6, %v66_v17, %v62_v16  ;;  %v71_v20 = vstv %s70_s7  ;;  %p566_p7 = scmp.lt.s32.totalorder %s560_s24, %s560_s24 }
  0x1e   :  { %v72_v21 = vsel %vm68_vm7, %v71_v20, %v67_v19  ;;  %v76_v22 = vstv %s75_s8 }
  0x1f   :  { %v77_v23 = vsel %vm73_vm8, %v76_v22, %v72_v21  ;;  %p567_p8 = por %p566_p7, %p565_p6 }
  0x20   :  { %v641_v24 = vmul.f32 %v480_v18, %v77_v23 }
  0x21   :  { %p568_p9 = pnand %p567_p8, %p561_p5 }
  0x22   :  { %v89_v25 = vand.u32 2139095040, %v641_v24  ;;  %v86_v27 = vand.u32 2147483647, %v641_v24  ;;  %vm88_vm0 = vcmp.lt.s32.totalorder %v641_v24, 0  ;;  %vm178_vm8 = vweird.f32 %v641_v24 }
  0x24   :  { %v90_v26 = vshrl.u32 %v89_v25, 23  ;;  %v93_v30 = vand.u32 8388607, %v86_v27  ;;  %vm87_vm1 = vcmp.le.f32.partialorder %v86_v27, 0.7853982 }
  0x26   :  { %v481_v28 = vadd.s32 4294967169, %v90_v26  ;;  %v94_v33 = vor.u32 8388608, %v93_v30 }
  0x28   :  { %v96_v29 = vadd.s32 1, %v481_v28  ;;  %v134_v53 = vshll.u32 %v94_v33, 8 }
  0x2a   :  { %vm97_vm9 = vcmp.gt.s32.totalorder %v96_v29, 0 }
  0x2b   :  { %v98_v31 = vsel %vm97_vm9, %v96_v29, 0 }
  0x2c   :  { %v100_v32 = vand.u32 31, %v98_v31  ;;  %v99_v34 = vshrl.u32 %v98_v31, 5 }
  0x2e   :  { %v101_v35 = vsub.s32 32, %v100_v32  ;;  %v103_v37 = vshll.u32 %v587_v36, %v100_v32  ;;  %v106_v39 = vshll.u32 %v588_v38, %v100_v32  ;;  %v109_v41 = vshll.u32 %v589_v40, %v100_v32 }
  0x2f   :  { %v112_v43 = vshll.u32 %v590_v42, %v100_v32  ;;  %v115_v45 = vshll.u32 %v591_v44, %v100_v32  ;;  %vm118_vm10 = vcmp.lt.s32.totalorder %v99_v34, 1  ;;  %vm121_vm11 = vcmp.lt.s32.totalorder %v99_v34, 4 }
  0x30   :  { %v102_v46 = vshrl.u32 %v587_v36, %v101_v35  ;;  %v104_v47 = vshrl.u32 %v588_v38, %v101_v35  ;;  %v107_v48 = vshrl.u32 %v589_v40, %v101_v35  ;;  %v110_v49 = vshrl.u32 %v590_v42, %v101_v35 }
  0x31   :  { %v113_v50 = vshrl.u32 %v591_v44, %v101_v35  ;;  %v116_v52 = vshrl.u32 %v592_v51, %v101_v35  ;;  %vm119_vm12 = vcmp.lt.s32.totalorder %v99_v34, 2  ;;  %vm120_vm13 = vcmp.lt.s32.totalorder %v99_v34, 3 }
  0x32   :  { %v105_v54 = vor.u32 %v104_v47, %v103_v37  ;;  %v108_v55 = vor.u32 %v107_v48, %v106_v39  ;;  %v111_v56 = vor.u32 %v110_v49, %v109_v41 }
  0x33   :  { %v114_v57 = vor.u32 %v113_v50, %v112_v43  ;;  %v117_v58 = vor.u32 %v116_v52, %v115_v45  ;;  %v84_v50 = vand.u32 127, %v36_v1 }
  0x34   :  { %v122_v59 = vsel %vm118_vm10, %v102_v46, %v105_v54  ;;  %v123_v60 = vsel %vm121_vm11, %v111_v56, 2102212464  ;;  %v126_v61 = vsel %vm118_vm10, %v105_v54, %v108_v55  ;;  %v130_v62 = vsel %vm118_vm10, %v108_v55, %v111_v56 }
  0x35   :  { %v124_v63 = vsel %vm120_vm13, %v108_v55, %v123_v60  ;;  %v127_v0 = vsel %vm121_vm11, %v114_v57, 920167782  ;;  %v131_v3 = vsel %vm121_vm11, %v117_v58, 1326507024  ;;  %vm85_vm9 = vcmp.lt.s32.totalorder %v84_v50, 16 }
  0x36   :  { %v128_v4 = vsel %vm120_vm13, %v111_v56, %v127_v0  ;;  %v132_v5 = vsel %vm120_vm13, %v114_v57, %v131_v3  ;;  %v125_v6 = vsel %vm119_vm12, %v122_v59, %v124_v63  ;;  %vm298_vm10 = vcmask 261120   ;;  %v32_v63 = vld [vmem:[%s690_s1 + $0x28] sm:$0xff]  ;;  %v489_v0 = vld [vmem:[%s690_s1 + $0x1] ss:$0 sm:$0xff] }
  0x37   :  { %v129_v7 = vsel %vm119_vm12, %v126_v61, %v128_v4  ;;  %v133_v8 = vsel %vm119_vm12, %v130_v62, %v132_v5  ;;  %v141_v13 = vmul.u32 %v134_v53, %v125_v6  ;;  %v35_v61 = vld [vmem:[%s690_s1 + $0x40] sm:$0xff]  ;;  %v33_v62 = vld [vmem:[%s690_s1 + $0x30] sm:$0xff]  ;;  %vm456_vm11 = vcmask 523264  }
  0x38   :  { %v647_v9 = vmul.u32.u64.low %v134_v53, %v133_v8  ;;  %v648_v10 = vmul.u32.u64.high %v134_v53, %v133_v8, %v647_v9  ;;  %v650_v11 = vmul.u32.u64.low %v134_v53, %v129_v7  ;;  %v651_v12 = vmul.u32.u64.high %v134_v53, %v129_v7, %v650_v11  ;;  %516 = vmatpush3.msra.mxu1 %v35_v61 }
  0x39   :  { %517 = vmatprep.subr.mxu1 %v585_v2 }
  0x3a   :  { %vm143_vm14 = vc.u32 %v648_v10, %v650_v11  ;;  %v144_v14 = vadd.s32 1, %v651_v12  ;;  %v142_v26 = vadd.s32 %v650_v11, %v648_v10 }
  0x3c   :  { %v145_v15 = vsel %vm143_vm14, %v144_v14, %v651_v12 }
  0x3d   :  { %v146_v16 = vadd.s32 %v145_v15, %v141_v13 }
  0x3f   :  { %v147_v17 = vadd.s32 536870912, %v146_v16 }
  0x41   :  { %v148_v18 = vshrl.u32 %v147_v17, 30 }
  0x43   :  { %v149_v19 = vshll.u32 %v148_v18, 30  ;;  %v172_v40 = vsub.s32 4, %v148_v18 }
  0x45   :  { %v150_v20 = vsub.s32 %v146_v16, %v149_v19  ;;  %v173_v43 = vsel %vm88_vm0, %v172_v40, %v148_v18 }
  0x46   :  { %v175_v45 = vsel %vm87_vm1, 0, %v173_v43 }
  0x47   :  { %v152_v21 = vsub.s32 0, %v150_v20  ;;  %v179_v46 = vadd.s32 3, %v175_v45  ;;  %v283_v48 = vand.u32 3, %v175_v45 }
  0x49   :  { %v482_v22 = vmin.u32 %v152_v21, %v150_v20  ;;  %v180_v47 = vand.u32 3, %v179_v46  ;;  %vm288_vm3 = vcmp.eq.s32.totalorder %v283_v48, 2  ;;  %vm285_vm5 = vcmp.eq.s32.totalorder %v283_v48, 0 }
  0x4a   :  { %vm284_vm7 = vcmp.lt.s32.totalorder %v283_v48, 2 }
  0x4b   :  { %v154_v23 = vclz %v482_v22  ;;  %vm185_vm2 = vcmp.eq.s32.totalorder %v180_v47, 2  ;;  %vm182_vm4 = vcmp.eq.s32.totalorder %v180_v47, 0  ;;  %vm181_vm6 = vcmp.lt.s32.totalorder %v180_v47, 2 }
  0x4d   :  { %v483_v25 = vadd.s32 4294967294, %v154_v23 }
  0x4f   :  { %vm484_vm15 = vcmp.lt.s32.totalorder %v483_v25, 0 }
  0x50   :  { %v157_v28 = vsel %vm484_vm15, 0, %v483_v25 }
  0x51   :  { %v158_v29 = vsub.s32 32, %v157_v28  ;;  %v159_v30 = vshll.u32 %v150_v20, %v157_v28  ;;  %v162_v31 = vsub.s32 4294967266, %v157_v28 }
  0x53   :  { %v160_v32 = vshrl.u32 %v142_v26, %v158_v29  ;;  %v163_v33 = vadd.s32 127, %v162_v31 }
  0x55   :  { %v161_v34 = vor.u32 %v160_v32, %v159_v30  ;;  %v164_v35 = vshll.u32 %v163_v33, 23 }
  0x57   :  { %v165_v36 = vor.u32 4788187, %v164_v35  ;;  %v168_v37 = vcvt.s32.f32 %v161_v34 }
  0x59   :  { %v166_v38 = vand.u32 2147483647, %v165_v36 }
  0x5b   :  { %v169_v39 = vmul.f32 %v168_v37, %v166_v38 }
  0x5d   :  { %v170_v41 = vxor.u32 2147483648, %v169_v39 }
  0x5f   :  { %v171_v42 = vsel %vm88_vm0, %v170_v41, %v169_v39 }
  0x60   :  { %v174_v44 = vsel %vm87_vm1, %v641_v24, %v171_v42  ;;  %v34_v24 = vld [vmem:[%s690_s1 + $0x38] sm:$0xff] }
  0x61   :  { %540 = vcosq.f32 %v174_v44  ;;  %518 = vmatpush3.msra.mxu1 %v34_v24 }
  0x62   :  { %542 = vsinq.f32 %v174_v44  ;;  %519 = vmatprep.subr.mxu1 %v585_v2 }
  0x63   :  { %520 = vmatpush3.msra.mxu1 %v33_v62 }
  0x64   :  { %521 = vmatprep.subr.mxu1 %v585_v2  ;;  %v492_v2 = vld [vmem:[%s690_s1 + $0x2] ss:$0 sm:$0xff] }
  0x65   :  { %522 = vmatpush3.msra.mxu1 %v32_v63 }
  0x6e   :  { %v541_v49 = vpop.eup %540 }
  0x6f   :  { %v543_v51 = vpop.eup %542  ;;  %v186_v52 = vxor.u32 2147483648, %v541_v49 }
  0x70   :  { %v183_v27 = vxor.u32 2147483648, %v543_v51 }
  0x71   :  { %v187_v53 = vsel %vm185_vm2, %v186_v52, %v543_v51  ;;  %v290_v54 = vsel %vm288_vm3, %v186_v52, %v543_v51 }
  0x72   :  { %v184_v55 = vsel %vm182_vm4, %v541_v49, %v183_v27  ;;  %v287_v56 = vsel %vm285_vm5, %v541_v49, %v183_v27 }
  0x73   :  { %v188_v57 = vsel %vm181_vm6, %v184_v55, %v187_v53  ;;  %v291_v58 = vsel %vm284_vm7, %v287_v56, %v290_v54 }
  0x74   :  { %v189_v1 = vsel %vm178_vm8, nan, %v188_v57  ;;  %v292_v59 = vsel %vm178_vm8, nan, %v291_v58 }
  0x75   :  { %v293_v60 = vsel %vm85_vm9, %v189_v1, %v292_v59 }
  0x76   :  { %513 = vmatmul.mubr.msk.f32.vlgmr.msra.gmra.mxu0 %vm298_vm10, %v293_v60 }
 0x136   :  { %v368_v3 = vpop.f32.mrf.mxu0 }
 0x137   :  { %v369_v4 = vadd.f32 %v489_v0, %v368_v3 }
 0x138   :  { %v514_v5 = vpop.f32.mrf.mxu0 }
 0x139   :  { %v491_v6 = vmul.f32 -1.442695, %v369_v4 }
 0x13b   :  { %544 = vpow2.f32 %v491_v6 }
 0x148   :  { %v545_v7 = vpop.eup %544 }
 0x149   :  { %v375_v8 = vadd.f32 1.0, %v545_v7 }
 0x14b   :  { %546 = vrcp.f32 %v375_v8 }
 0x158   :  { %v547_v9 = vpop.eup %546 }
 0x159   :  { %v378_v10 = vmul.f32 %v547_v9, %v369_v4 }
 0x15b   :  { %524 = vmatmul.mubr.msk.f32.vlgmr.msra.gmra.mxu1 %vm298_vm10, %v378_v10 }
 0x21b   :  { %v452_v11 = vpop.f32.mrf.mxu1 }
 0x21c   :  { %v453_v12 = vadd.f32 %v492_v2, %v452_v11 }
 0x21d   :  { %v525_v13 = vpop.f32.mrf.mxu1 }
 0x21e   :  { %457 = vst.msk [vmem:[#allocation5] sm:$0xff] %vm456_vm11, %v453_v12 }
 0x21f   :  { %571 = shalt.err (!%p568_p9)
}
 0x220   :  { %467 = dma.vmem_to_hbm [thread:$0]  %s465_s23, 128, %s691_s2, [#allocation3]  }
 0x221   :  { %582 = dma.done.wait [#allocation3], 128  }
 0x222   :  { %583 = vsyncadd [#allocation3], 4294967168 }
 0x223   :  { %471 = vsyncpa [#allocation3], 1 }
 0x224   :  { %472 = vsyncpa [#allocation4], 1 }

</bundles_post_ra>
